<compile_context>
chip_gen: v5e
topology: v5e:2x2
jax: 0.10.0
libtpu: 0.0.40
codegen_flags: <defaults>
</compile_context>

<pallas_src>
import math
from functools import partial

import jax
import jax.numpy as jnp
from jax import lax
from jax.experimental import pallas as pl
from jax.experimental.pallas import tpu as pltpu

EPS = 1e-8


# ----------------------------- in-kernel helpers -----------------------------

def _token_shift(x):
    # x: (n, d).  First half of the feature dim is kept, second half is the
    # previous token (row 0 zero-padded).  Done with a sublane roll + masks,
    # avoiding lane-axis slicing / concatenation.
    n, d = x.shape
    shifted = pltpu.roll(x, shift=1, axis=0)                 # row i <- row i-1
    row = lax.broadcasted_iota(jnp.int32, (n, d), 0)
    lane = lax.broadcasted_iota(jnp.int32, (n, d), 1)
    shifted = jnp.where(row == 0, 0.0, shifted)              # zero-pad first token
    return jnp.where(lane >= d // 2, shifted, x)             # shift only 2nd half


def _rmsnorm(x, g):
    # x: (n, d), g: (1, d).  Matches torch: ||x|| * d^-0.5, clamp(eps).
    d = x.shape[-1]
    norm = jnp.sqrt(jnp.sum(x * x, axis=-1, keepdims=True)) * (d ** -0.5)
    inv = pl.reciprocal(jnp.maximum(norm, EPS), approx=True)
    return x * inv * g


# --------------------------------- kernel ------------------------------------

def transformer_kernel(x_ref, bias_ref, attn_g_ref, wq_ref, wk_ref, wv_ref,
                       wo_ref, ff_g_ref, w1_ref, b1_ref, w2_ref, b2_ref,
                       final_g_ref, o_ref, x_acc, *, heads, dim_head):
    layer = pl.program_id(1)
    n_layers = pl.num_programs(1)

    # Load the activation into the VMEM residual accumulator once per batch row.
    @pl.when(layer == 0)
    def _():
        x_acc[...] = x_ref[0].astype(jnp.float32)

    x = x_acc[...]                                           # (n, d) f32 residual
    n, d = x.shape
    scale = dim_head ** -0.5
    bf16 = jnp.bfloat16

    # ------------------------------ attention --------------------------------
    xn = _rmsnorm(_token_shift(x), attn_g_ref[0])            # (n, d) f32
    xn_b = xn.astype(bf16)

    # Per-head Q via one batched matmul: (h,n,d) @ (h,d,dh) -> (h,n,dh)
    xh = jnp.broadcast_to(xn_b[None], (heads, n, d))
    q = jnp.einsum('hnd,hde->hne', xh, wq_ref[0],
                   preferred_element_type=jnp.float32)

    # Multi-query: single K/V head shared across all query heads.
    k = jnp.dot(xn_b, wk_ref[0], preferred_element_type=jnp.float32)   # (n, dh)
    v = jnp.dot(xn_b, wv_ref[0], preferred_element_type=jnp.float32)   # (n, dh)
    kh = jnp.broadcast_to(k.astype(bf16)[None], (heads, n, dim_head))
    vh = jnp.broadcast_to(v.astype(bf16)[None], (heads, n, dim_head))

    sim = jnp.einsum('hid,hjd->hij', q.astype(bf16), kh,
                     preferred_element_type=jnp.float32) * scale        # (h,n,n)
    sim = sim + bias_ref[...]                     # fused ALiBi + causal mask
    sim = sim - jnp.max(sim, axis=-1, keepdims=True)
    p = jnp.exp(sim)
    p = p * pl.reciprocal(jnp.sum(p, axis=-1, keepdims=True), approx=True)

    ctx = jnp.einsum('hij,hjd->hid', p.astype(bf16), vh,
                     preferred_element_type=jnp.float32)                # (h,n,dh)
    proj = jnp.einsum('hnd,hde->hne', ctx.astype(bf16), wo_ref[0],
                      preferred_element_type=jnp.float32)               # (h,n,d)
    x = x + jnp.sum(proj, axis=0)                                       # residual

    # ----------------------------- feed-forward ------------------------------
    yn = _rmsnorm(_token_shift(x), ff_g_ref[0]).astype(bf16)
    h = jnp.dot(yn, w1_ref[0], preferred_element_type=jnp.float32) + b1_ref[0]
    h = 0.5 * h * (1.0 + lax.erf(h * (2.0 ** -0.5)))          # exact GELU (f32)
    ff = jnp.dot(h.astype(bf16), w2_ref[0],
                 preferred_element_type=jnp.float32) + b2_ref[0]
    x = x + ff

    x_acc[...] = x

    # Final RMSNorm + single lane-resident store after the last layer.
    @pl.when(layer == n_layers - 1)
    def _():
        o_ref[0] = _rmsnorm(x_acc[...], final_g_ref[...]).astype(o_ref.dtype)


# -------------------------------- wrapper ------------------------------------

def _nbytes(a):
    return int(a.size) * a.dtype.itemsize


def transformer_forward(x, packed, attn_bias, *, heads, dim_head):
    B, N, D = x.shape
    L = packed["wq"].shape[0]

    kern = partial(transformer_kernel, heads=heads, dim_head=dim_head)

    def layer_spec(arr):
        zeros = (0,) * (arr.ndim - 1)
        return pl.BlockSpec((1,) + tuple(arr.shape[1:]),
                            lambda b, l, z=zeros: (l,) + z)

    def const_spec(arr):
        zeros = (0,) * arr.ndim
        return pl.BlockSpec(tuple(arr.shape), lambda b, l, z=zeros: z)

    # Explicit VMEM budget from actual per-grid-step block footprint
    # (double-buffered) + headroom; clamped to stay portable across v5e/v6e/v7x.
    per_step = (2 * (_nbytes(x) // B) + _nbytes(attn_bias)
                + _nbytes(packed["final_g"])
                + sum(_nbytes(packed[k]) // packed[k].shape[0]
                      for k in ("attn_g", "wq", "wk", "wv", "wo",
                                "ff_g", "w1", "b1", "w2", "b2")))
    vmem_limit = int(min(max(2 * per_step + (4 << 20), 16 << 20), 96 << 20))

    return pl.pallas_call(
        kern,
        out_shape=jax.ShapeDtypeStruct((B, N, D), x.dtype),
        grid=(B, L),
        in_specs=[
            pl.BlockSpec((1, N, D), lambda b, l: (b, 0, 0)),   # x (read at l==0)
            const_spec(attn_bias),                             # causal + ALiBi
            layer_spec(packed["attn_g"]),
            layer_spec(packed["wq"]),
            layer_spec(packed["wk"]),
            layer_spec(packed["wv"]),
            layer_spec(packed["wo"]),
            layer_spec(packed["ff_g"]),
            layer_spec(packed["w1"]),
            layer_spec(packed["b1"]),
            layer_spec(packed["w2"]),
            layer_spec(packed["b2"]),
            const_spec(packed["final_g"]),
        ],
        out_specs=pl.BlockSpec((1, N, D), lambda b, l: (b, 0, 0)),
        scratch_shapes=[pltpu.VMEM((N, D), jnp.float32)],      # residual stream
        compiler_params=pltpu.CompilerParams(
            dimension_semantics=("parallel", "arbitrary"),
            vmem_limit_bytes=vmem_limit),
    )(x, attn_bias, packed["attn_g"], packed["wq"], packed["wk"],
      packed["wv"], packed["wo"], packed["ff_g"], packed["w1"],
      packed["b1"], packed["w2"], packed["b2"], packed["final_g"])


# ------------------------- params / ALiBi construction ------------------------

def get_alibi_slopes(heads):
    def slopes_pow2(n):
        start = 2 ** (-2 ** (-(math.log2(n) - 3)))
        return [start * (start ** i) for i in range(n)]
    if math.log2(heads).is_integer():
        return slopes_pow2(heads)
    closest = 2 ** math.floor(math.log2(heads))
    return (slopes_pow2(closest)
            + slopes_pow2(2 * closest)[0::2][:heads - closest])


def make_alibi_bias(heads, n):
    slopes = jnp.asarray(get_alibi_slopes(heads), jnp.float32)           # (h,)
    return jnp.arange(n, dtype=jnp.float32)[None, None, :] * slopes[:, None, None]


def make_fused_attn_bias(heads, n):
    # ALiBi bias with the causal mask folded in (large negative additive term).
    alibi = make_alibi_bias(heads, n)                                    # (h,1,n)
    i = jnp.arange(n)[:, None]
    j = jnp.arange(n)[None, :]
    neg = jnp.float32(-0.7 * float(jnp.finfo(jnp.float32).max))
    bias = jnp.broadcast_to(alibi, (heads, n, n))
    return jnp.where((j > i)[None, :, :], neg, bias).astype(jnp.float32)


def linear_params(key, fan_in, fan_out, bias):
    bound = 1.0 / math.sqrt(fan_in)
    kw, kb = jax.random.split(key)
    w = jax.random.uniform(kw, (fan_in, fan_out), jnp.float32, -bound, bound)
    if not bias:
        return w
    b = jax.random.uniform(kb, (1, fan_out), jnp.float32, -bound, bound)
    return w, b


def init_params(key, *, dim, layers, heads, dim_head, ff_mult):
    inner = heads * dim_head
    params = {"layers": []}
    for _ in range(layers):
        key, k1, k2, k3, k4, k5 = jax.random.split(key, 6)
        wq = linear_params(k1, dim, inner, bias=False)
        wkv = linear_params(k2, dim, 2 * dim_head, bias=False)
        wo = linear_params(k3, inner, dim, bias=False)
        w1, b1 = linear_params(k4, dim, dim * ff_mult, bias=True)
        w2, b2 = linear_params(k5, dim * ff_mult, dim, bias=True)
        params["layers"].append(dict(
            attn_g=jnp.ones((1, dim), jnp.float32), wq=wq, wkv=wkv, wo=wo,
            ff_g=jnp.ones((1, dim), jnp.float32), w1=w1, b1=b1, w2=w2, b2=b2))
    params["final_g"] = jnp.ones((1, dim), jnp.float32)
    return params


def pack_params(params, *, heads, dim_head):
    # Stack per-layer weights on a leading layer axis; split Q/KV/O into
    # per-head layouts; cast matmul weights to bf16 (f32 accumulation in-kernel).
    dim = params["final_g"].shape[-1]
    bf16 = jnp.bfloat16

    def stack(fn):
        return jnp.stack([fn(l) for l in params["layers"]])

    wq = stack(lambda l: l["wq"].reshape(dim, heads, dim_head).transpose(1, 0, 2))
    wk = stack(lambda l: l["wkv"][:, :dim_head])
    wv = stack(lambda l: l["wkv"][:, dim_head:])
    wo = stack(lambda l: l["wo"].reshape(heads, dim_head, dim))
    return dict(
        attn_g=stack(lambda l: l["attn_g"]),
        ff_g=stack(lambda l: l["ff_g"]),
        wq=wq.astype(bf16), wk=wk.astype(bf16), wv=wv.astype(bf16),
        wo=wo.astype(bf16),
        w1=stack(lambda l: l["w1"]).astype(bf16),
        b1=stack(lambda l: l["b1"]),
        w2=stack(lambda l: l["w2"]).astype(bf16),
        b2=stack(lambda l: l["b2"]),
        final_g=params["final_g"])


# ----------------------------- pure-JAX reference ------------------------------

def ref_transformer(x, params, alibi_bias, *, heads, dim_head):
    HI = jax.lax.Precision.HIGHEST

    def rmsnorm(t, g):
        norm = jnp.sqrt(jnp.sum(t * t, axis=-1, keepdims=True)) * (t.shape[-1] ** -0.5)
        return t / jnp.maximum(norm, EPS) * g

    def token_shift(t):
        half = t.shape[-1] // 2
        a, s = t[..., :half], t[..., half:]
        s = jnp.pad(s, ((0, 0), (1, 0), (0, 0)))[:, :-1, :]
        return jnp.concatenate([a, s], axis=-1)

    b, n, dim = x.shape
    neg = -jnp.finfo(jnp.float32).max
    row = jnp.arange(n)[:, None]
    col = jnp.arange(n)[None, :]
    causal = col > row

    for layer in params["layers"]:
        xn = rmsnorm(token_shift(x), layer["attn_g"])
        q = jnp.einsum('bnd,de->bne', xn, layer["wq"], precision=HI)
        kv = jnp.einsum('bnd,de->bne', xn, layer["wkv"], precision=HI)
        k, v = kv[..., :dim_head], kv[..., dim_head:]
        q = q.reshape(b, n, heads, dim_head).transpose(0, 2, 1, 3)
        sim = jnp.einsum('bhid,bjd->bhij', q, k, precision=HI) * (dim_head ** -0.5)
        sim = sim + alibi_bias[None]
        sim = jnp.where(causal[None, None], neg, sim)
        attn = jax.nn.softmax(sim, axis=-1)
        out = jnp.einsum('bhij,bjd->bhid', attn, v, precision=HI)
        out = out.transpose(0, 2, 1, 3).reshape(b, n, heads * dim_head)
        x = jnp.einsum('bne,ed->bnd', out, layer["wo"], precision=HI) + x

        xn = rmsnorm(token_shift(x), layer["ff_g"])
        h = jnp.einsum('bnd,de->bne', xn, layer["w1"], precision=HI) + layer["b1"]
        h = 0.5 * h * (1.0 + lax.erf(h * (2.0 ** -0.5)))
        x = jnp.einsum('bne,ed->bnd', h, layer["w2"], precision=HI) + layer["b2"] + x

    return rmsnorm(x, params["final_g"])


# ----------------------------------- main --------------------------------------

if __name__ == "__main__":
    batch, seq, dim = 2, 8, 32
    layers, heads, dim_head, ff_mult = 2, 4, 16, 4

    key = jax.random.PRNGKey(0)
    kx, kp = jax.random.split(key)
    x = jax.random.normal(kx, (batch, seq, dim), jnp.float32)
    params = init_params(kp, dim=dim, layers=layers, heads=heads,
                         dim_head=dim_head, ff_mult=ff_mult)

    alibi = make_alibi_bias(heads, seq)            # (h, 1, n) for the reference
    fused_bias = make_fused_attn_bias(heads, seq)  # (h, n, n) causal + ALiBi
    packed = pack_params(params, heads=heads, dim_head=dim_head)

    out = transformer_forward(x, packed, fused_bias,
                              heads=heads, dim_head=dim_head)
    out = jax.block_until_ready(out)

    ref = ref_transformer(x, params, alibi, heads=heads, dim_head=dim_head)
    assert out.shape == (batch, seq, dim)
    assert bool(jnp.all(jnp.isfinite(out)))
    # bf16 MXU operands + approx reciprocals vs an f32 HIGHEST-precision reference.
    assert bool(jnp.allclose(out, ref, atol=2e-2, rtol=2e-2))

    print("KERNEL_OK")
</pallas_src>

<mosaic_0001>
module attributes {stable_mosaic.version = 11 : i64} {
  func.func @transformer_kernel(%arg0: i32, %arg1: i32, %arg2: memref<1x8x32xf32, #tpu.memory_space<vmem>>, %arg3: memref<4x8x8xf32, #tpu.memory_space<vmem>>, %arg4: memref<1x1x32xf32, #tpu.memory_space<vmem>>, %arg5: memref<1x4x32x16xbf16, #tpu.memory_space<vmem>>, %arg6: memref<1x32x16xbf16, #tpu.memory_space<vmem>>, %arg7: memref<1x32x16xbf16, #tpu.memory_space<vmem>>, %arg8: memref<1x4x16x32xbf16, #tpu.memory_space<vmem>>, %arg9: memref<1x1x32xf32, #tpu.memory_space<vmem>>, %arg10: memref<1x32x128xbf16, #tpu.memory_space<vmem>>, %arg11: memref<1x1x128xf32, #tpu.memory_space<vmem>>, %arg12: memref<1x128x32xbf16, #tpu.memory_space<vmem>>, %arg13: memref<1x1x32xf32, #tpu.memory_space<vmem>>, %arg14: memref<1x32xf32, #tpu.memory_space<vmem>>, %arg15: memref<1x8x32xf32, #tpu.memory_space<vmem>>, %arg16: memref<8x32xf32, #tpu.memory_space<vmem>>) attributes {dimension_semantics = [#tpu.dimension_semantics<parallel>, #tpu.dimension_semantics<arbitrary>], iteration_bounds = array<i64: 2, 2>, scalar_prefetch = 0 : i64, scratch_operands = 1 : i64, tpu.core_type = #tpu.core_type<tc>, window_params = [{transform_indices = @transform_0, window_bounds = array<i64: 1, 8, 32>}, {pipeline_mode = #tpu.pipeline_mode<synchronous>, transform_indices = @transform_1, window_bounds = array<i64: 4, 8, 8>}, {transform_indices = @transform_2, window_bounds = array<i64: 1, 1, 32>}, {transform_indices = @transform_3, window_bounds = array<i64: 1, 4, 32, 16>}, {transform_indices = @transform_4, window_bounds = array<i64: 1, 32, 16>}, {transform_indices = @transform_5, window_bounds = array<i64: 1, 32, 16>}, {transform_indices = @transform_6, window_bounds = array<i64: 1, 4, 16, 32>}, {transform_indices = @transform_7, window_bounds = array<i64: 1, 1, 32>}, {transform_indices = @transform_8, window_bounds = array<i64: 1, 32, 128>}, {transform_indices = @transform_9, window_bounds = array<i64: 1, 1, 128>}, {transform_indices = @transform_10, window_bounds = array<i64: 1, 128, 32>}, {transform_indices = @transform_11, window_bounds = array<i64: 1, 1, 32>}, {pipeline_mode = #tpu.pipeline_mode<synchronous>, transform_indices = @transform_12, window_bounds = array<i64: 1, 32>}, {transform_indices = @transform_13, window_bounds = array<i64: 1, 8, 32>}]} {
    %c0_i32 = arith.constant 0 : i32
    %0 = arith.cmpi eq, %arg1, %c0_i32 : i32
    %1 = arith.extui %0 : i1 to i32
    %c0_i32_0 = arith.constant 0 : i32
    %2 = arith.cmpi ne, %1, %c0_i32_0 : i32
    scf.if %2 {
      %c0_67 = arith.constant 0 : index
      %c0_68 = arith.constant 0 : index
      %c0_69 = arith.constant 0 : index
      %128 = vector.load %arg2[%c0_67, %c0_68, %c0_69] : memref<1x8x32xf32, #tpu.memory_space<vmem>>, vector<1x8x32xf32>
      %129 = vector.shape_cast %128 : vector<1x8x32xf32> to vector<8x32xf32>
      %c0_70 = arith.constant 0 : index
      %c0_71 = arith.constant 0 : index
      %130 = vector.load %arg16[%c0_70, %c0_71] : memref<8x32xf32, #tpu.memory_space<vmem>>, vector<8x32xf32>
      tpu.vector_store %arg16[%c0_70, %c0_71], %129 {strides = array<i32>} : memref<8x32xf32, #tpu.memory_space<vmem>>, vector<8x32xf32>,
    } else {
    }
    %c0 = arith.constant 0 : index
    %c0_1 = arith.constant 0 : index
    %3 = vector.load %arg16[%c0, %c0_1] : memref<8x32xf32, #tpu.memory_space<vmem>>, vector<8x32xf32>
    %c1_i32 = arith.constant 1 : i32
    %4 = tpu.dynamic_rotate %3 by %c1_i32 dim 0 : vector<8x32xf32>, i32 -> vector<8x32xf32>
    %5 = tpu.iota {dimensions = array<i32: 0>} : vector<8x32xi32>
    %6 = tpu.iota {dimensions = array<i32: 1>} : vector<8x32xi32>
    %c0_i32_2 = arith.constant 0 : i32
    %7 = vector.broadcast %c0_i32_2 : i32 to vector<8x32xi32>
    %8 = arith.cmpi eq, %5, %7 : vector<8x32xi32>
    %cst = arith.constant 0.000000e+00 : f32
    %9 = vector.broadcast %cst : f32 to vector<8x32xf32>
    %10 = arith.select %8, %9, %4 : vector<8x32xi1>, vector<8x32xf32>
    %c16_i32 = arith.constant 16 : i32
    %11 = vector.broadcast %c16_i32 : i32 to vector<8x32xi32>
    %12 = arith.cmpi sge, %6, %11 : vector<8x32xi32>
    %13 = arith.select %12, %10, %3 : vector<8x32xi1>, vector<8x32xf32>
    %c0_3 = arith.constant 0 : index
    %c0_4 = arith.constant 0 : index
    %c0_5 = arith.constant 0 : index
    %14 = vector.load %arg4[%c0_3, %c0_4, %c0_5] : memref<1x1x32xf32, #tpu.memory_space<vmem>>, vector<1x1x32xf32>
    %15 = vector.shape_cast %14 : vector<1x1x32xf32> to vector<1x32xf32>
    %16 = arith.mulf %13, %13 : vector<8x32xf32>
    %cst_6 = arith.constant dense<0.000000e+00> : vector<8xf32>
    %17 = vector.multi_reduction <add>, %16, %cst_6 [1] : vector<8x32xf32> to vector<8xf32>
    %18 = vector.shape_cast %17 : vector<8xf32> to vector<8x1xf32>
    %19 = math.sqrt %18 : vector<8x1xf32>
    %cst_7 = arith.constant 0.176776692 : f32
    %20 = vector.broadcast %cst_7 : f32 to vector<8x1xf32>
    %21 = arith.mulf %19, %20 : vector<8x1xf32>
    %cst_8 = arith.constant 9.99999993E-9 : f32
    %22 = vector.broadcast %cst_8 : f32 to vector<8x1xf32>
    %23 = arith.maximumf %21, %22 : vector<8x1xf32>
    %24 = tpu.reciprocal %23 {approx = true} : vector<8x1xf32> -> vector<8x1xf32>
    %25 = vector.broadcast %24 : vector<8x1xf32> to vector<8x32xf32>
    %26 = arith.mulf %13, %25 : vector<8x32xf32>
    %27 = vector.broadcast %15 : vector<1x32xf32> to vector<8x32xf32>
    %28 = arith.mulf %26, %27 : vector<8x32xf32>
    %29 = arith.truncf %28 : vector<8x32xf32> to vector<8x32xbf16>
    %30 = vector.shape_cast %29 : vector<8x32xbf16> to vector<1x8x32xbf16>
    %31 = vector.shape_cast %30 : vector<1x8x32xbf16> to vector<1x8x32xbf16>
    %32 = vector.broadcast %31 : vector<1x8x32xbf16> to vector<4x8x32xbf16>
    %c0_9 = arith.constant 0 : index
    %c0_10 = arith.constant 0 : index
    %c0_11 = arith.constant 0 : index
    %c0_12 = arith.constant 0 : index
    %33 = vector.load %arg5[%c0_9, %c0_10, %c0_11, %c0_12] : memref<1x4x32x16xbf16, #tpu.memory_space<vmem>>, vector<1x4x32x16xbf16>
    %34 = vector.shape_cast %33 : vector<1x4x32x16xbf16> to vector<4x32x16xbf16>
    "tpu.trace_start"() <{level = 10 : i32, message = "hnd,hde->hne"}> : () -> ()
    %cst_13 = arith.constant dense<0.000000e+00> : vector<4x8x16xf32>
    %35 = tpu.matmul %32, %34, %cst_13 {dimension_numbers = #tpu.dot_dimension_numbers<[2], [1], [1], [2], [0, 0, 0, 1, 1, 2], [0], [0]>} : vector<4x8x32xbf16>, vector<4x32x16xbf16>, vector<4x8x16xf32> -> vector<4x8x16xf32>
    "tpu.trace_stop"() : () -> ()
    %c0_14 = arith.constant 0 : index
    %c0_15 = arith.constant 0 : index
    %c0_16 = arith.constant 0 : index
    %36 = vector.load %arg6[%c0_14, %c0_15, %c0_16] : memref<1x32x16xbf16, #tpu.memory_space<vmem>>, vector<1x32x16xbf16>
    %37 = vector.shape_cast %36 : vector<1x32x16xbf16> to vector<32x16xbf16>
    %cst_17 = arith.constant dense<0.000000e+00> : vector<8x16xf32>
    %38 = tpu.matmul %29, %37, %cst_17 {dimension_numbers = #tpu.dot_dimension_numbers<[1], [0], [0], [1], [0, 0, 1, 1], [], []>} : vector<8x32xbf16>, vector<32x16xbf16>, vector<8x16xf32> -> vector<8x16xf32>
    %c0_18 = arith.constant 0 : index
    %c0_19 = arith.constant 0 : index
    %c0_20 = arith.constant 0 : index
    %39 = vector.load %arg7[%c0_18, %c0_19, %c0_20] : memref<1x32x16xbf16, #tpu.memory_space<vmem>>, vector<1x32x16xbf16>
    %40 = vector.shape_cast %39 : vector<1x32x16xbf16> to vector<32x16xbf16>
    %cst_21 = arith.constant dense<0.000000e+00> : vector<8x16xf32>
    %41 = tpu.matmul %29, %40, %cst_21 {dimension_numbers = #tpu.dot_dimension_numbers<[1], [0], [0], [1], [0, 0, 1, 1], [], []>} : vector<8x32xbf16>, vector<32x16xbf16>, vector<8x16xf32> -> vector<8x16xf32>
    %42 = arith.truncf %38 : vector<8x16xf32> to vector<8x16xbf16>
    %43 = vector.shape_cast %42 : vector<8x16xbf16> to vector<1x8x16xbf16>
    %44 = vector.shape_cast %43 : vector<1x8x16xbf16> to vector<1x8x16xbf16>
    %45 = vector.broadcast %44 : vector<1x8x16xbf16> to vector<4x8x16xbf16>
    %46 = arith.truncf %41 : vector<8x16xf32> to vector<8x16xbf16>
    %47 = vector.shape_cast %46 : vector<8x16xbf16> to vector<1x8x16xbf16>
    %48 = vector.shape_cast %47 : vector<1x8x16xbf16> to vector<1x8x16xbf16>
    %49 = vector.broadcast %48 : vector<1x8x16xbf16> to vector<4x8x16xbf16>
    %50 = arith.truncf %35 : vector<4x8x16xf32> to vector<4x8x16xbf16>
    "tpu.trace_start"() <{level = 10 : i32, message = "hid,hjd->hij"}> : () -> ()
    %cst_22 = arith.constant dense<0.000000e+00> : vector<4x8x8xf32>
    %51 = tpu.matmul %50, %45, %cst_22 {dimension_numbers = #tpu.dot_dimension_numbers<[2], [2], [1], [1], [0, 0, 0, 1, 1, 1], [0], [0]>} : vector<4x8x16xbf16>, vector<4x8x16xbf16>, vector<4x8x8xf32> -> vector<4x8x8xf32>
    "tpu.trace_stop"() : () -> ()
    %cst_23 = arith.constant 2.500000e-01 : f32
    %52 = vector.broadcast %cst_23 : f32 to vector<4x8x8xf32>
    %53 = arith.mulf %51, %52 : vector<4x8x8xf32>
    %c0_24 = arith.constant 0 : index
    %c0_25 = arith.constant 0 : index
    %c0_26 = arith.constant 0 : index
    %54 = vector.load %arg3[%c0_24, %c0_25, %c0_26] : memref<4x8x8xf32, #tpu.memory_space<vmem>>, vector<4x8x8xf32>
    %55 = arith.addf %53, %54 : vector<4x8x8xf32>
    %cst_27 = arith.constant dense<0xFF800000> : vector<4x8xf32>
    %56 = vector.multi_reduction <maximumf>, %55, %cst_27 [2] : vector<4x8x8xf32> to vector<4x8xf32>
    %57 = vector.shape_cast %56 : vector<4x8xf32> to vector<4x8x1xf32>
    %58 = vector.broadcast %57 : vector<4x8x1xf32> to vector<4x8x8xf32>
    %59 = arith.subf %55, %58 : vector<4x8x8xf32>
    %60 = math.exp %59 : vector<4x8x8xf32>
    %cst_28 = arith.constant dense<0.000000e+00> : vector<4x8xf32>
    %61 = vector.multi_reduction <add>, %60, %cst_28 [2] : vector<4x8x8xf32> to vector<4x8xf32>
    %62 = vector.shape_cast %61 : vector<4x8xf32> to vector<4x8x1xf32>
    %63 = tpu.reciprocal %62 {approx = true} : vector<4x8x1xf32> -> vector<4x8x1xf32>
    %64 = vector.broadcast %63 : vector<4x8x1xf32> to vector<4x8x8xf32>
    %65 = arith.mulf %60, %64 : vector<4x8x8xf32>
    %66 = arith.truncf %65 : vector<4x8x8xf32> to vector<4x8x8xbf16>
    "tpu.trace_start"() <{level = 10 : i32, message = "hij,hjd->hid"}> : () -> ()
    %cst_29 = arith.constant dense<0.000000e+00> : vector<4x8x16xf32>
    %67 = tpu.matmul %66, %49, %cst_29 {dimension_numbers = #tpu.dot_dimension_numbers<[2], [1], [1], [2], [0, 0, 0, 1, 1, 2], [0], [0]>} : vector<4x8x8xbf16>, vector<4x8x16xbf16>, vector<4x8x16xf32> -> vector<4x8x16xf32>
    "tpu.trace_stop"() : () -> ()
    %68 = arith.truncf %67 : vector<4x8x16xf32> to vector<4x8x16xbf16>
    %c0_30 = arith.constant 0 : index
    %c0_31 = arith.constant 0 : index
    %c0_32 = arith.constant 0 : index
    %c0_33 = arith.constant 0 : index
    %69 = vector.load %arg8[%c0_30, %c0_31, %c0_32, %c0_33] : memref<1x4x16x32xbf16, #tpu.memory_space<vmem>>, vector<1x4x16x32xbf16>
    %70 = vector.shape_cast %69 : vector<1x4x16x32xbf16> to vector<4x16x32xbf16>
    "tpu.trace_start"() <{level = 10 : i32, message = "hnd,hde->hne"}> : () -> ()
    %cst_34 = arith.constant dense<0.000000e+00> : vector<4x8x32xf32>
    %71 = tpu.matmul %68, %70, %cst_34 {dimension_numbers = #tpu.dot_dimension_numbers<[2], [1], [1], [2], [0, 0, 0, 1, 1, 2], [0], [0]>} : vector<4x8x16xbf16>, vector<4x16x32xbf16>, vector<4x8x32xf32> -> vector<4x8x32xf32>
    "tpu.trace_stop"() : () -> ()
    %cst_35 = arith.constant dense<0.000000e+00> : vector<8x32xf32>
    %72 = vector.multi_reduction <add>, %71, %cst_35 [0] : vector<4x8x32xf32> to vector<8x32xf32>
    %73 = arith.addf %3, %72 : vector<8x32xf32>
    %c1_i32_36 = arith.constant 1 : i32
    %74 = tpu.dynamic_rotate %73 by %c1_i32_36 dim 0 : vector<8x32xf32>, i32 -> vector<8x32xf32>
    %75 = tpu.iota {dimensions = array<i32: 0>} : vector<8x32xi32>
    %76 = tpu.iota {dimensions = array<i32: 1>} : vector<8x32xi32>
    %c0_i32_37 = arith.constant 0 : i32
    %77 = vector.broadcast %c0_i32_37 : i32 to vector<8x32xi32>
    %78 = arith.cmpi eq, %75, %77 : vector<8x32xi32>
    %cst_38 = arith.constant 0.000000e+00 : f32
    %79 = vector.broadcast %cst_38 : f32 to vector<8x32xf32>
    %80 = arith.select %78, %79, %74 : vector<8x32xi1>, vector<8x32xf32>
    %c16_i32_39 = arith.constant 16 : i32
    %81 = vector.broadcast %c16_i32_39 : i32 to vector<8x32xi32>
    %82 = arith.cmpi sge, %76, %81 : vector<8x32xi32>
    %83 = arith.select %82, %80, %73 : vector<8x32xi1>, vector<8x32xf32>
    %c0_40 = arith.constant 0 : index
    %c0_41 = arith.constant 0 : index
    %c0_42 = arith.constant 0 : index
    %84 = vector.load %arg9[%c0_40, %c0_41, %c0_42] : memref<1x1x32xf32, #tpu.memory_space<vmem>>, vector<1x1x32xf32>
    %85 = vector.shape_cast %84 : vector<1x1x32xf32> to vector<1x32xf32>
    %86 = arith.mulf %83, %83 : vector<8x32xf32>
    %cst_43 = arith.constant dense<0.000000e+00> : vector<8xf32>
    %87 = vector.multi_reduction <add>, %86, %cst_43 [1] : vector<8x32xf32> to vector<8xf32>
    %88 = vector.shape_cast %87 : vector<8xf32> to vector<8x1xf32>
    %89 = math.sqrt %88 : vector<8x1xf32>
    %cst_44 = arith.constant 0.176776692 : f32
    %90 = vector.broadcast %cst_44 : f32 to vector<8x1xf32>
    %91 = arith.mulf %89, %90 : vector<8x1xf32>
    %cst_45 = arith.constant 9.99999993E-9 : f32
    %92 = vector.broadcast %cst_45 : f32 to vector<8x1xf32>
    %93 = arith.maximumf %91, %92 : vector<8x1xf32>
    %94 = tpu.reciprocal %93 {approx = true} : vector<8x1xf32> -> vector<8x1xf32>
    %95 = vector.broadcast %94 : vector<8x1xf32> to vector<8x32xf32>
    %96 = arith.mulf %83, %95 : vector<8x32xf32>
    %97 = vector.broadcast %85 : vector<1x32xf32> to vector<8x32xf32>
    %98 = arith.mulf %96, %97 : vector<8x32xf32>
    %99 = arith.truncf %98 : vector<8x32xf32> to vector<8x32xbf16>
    %c0_46 = arith.constant 0 : index
    %c0_47 = arith.constant 0 : index
    %c0_48 = arith.constant 0 : index
    %100 = vector.load %arg10[%c0_46, %c0_47, %c0_48] : memref<1x32x128xbf16, #tpu.memory_space<vmem>>, vector<1x32x128xbf16>
    %101 = vector.shape_cast %100 : vector<1x32x128xbf16> to vector<32x128xbf16>
    %cst_49 = arith.constant dense<0.000000e+00> : vector<8x128xf32>
    %102 = tpu.matmul %99, %101, %cst_49 {dimension_numbers = #tpu.dot_dimension_numbers<[1], [0], [0], [1], [0, 0, 1, 1], [], []>} : vector<8x32xbf16>, vector<32x128xbf16>, vector<8x128xf32> -> vector<8x128xf32>
    %c0_50 = arith.constant 0 : index
    %c0_51 = arith.constant 0 : index
    %c0_52 = arith.constant 0 : index
    %103 = vector.load %arg11[%c0_50, %c0_51, %c0_52] : memref<1x1x128xf32, #tpu.memory_space<vmem>>, vector<1x1x128xf32>
    %104 = vector.shape_cast %103 : vector<1x1x128xf32> to vector<1x128xf32>
    %105 = vector.broadcast %104 : vector<1x128xf32> to vector<8x128xf32>
    %106 = arith.addf %102, %105 : vector<8x128xf32>
    %cst_53 = arith.constant 5.000000e-01 : f32
    %107 = vector.broadcast %cst_53 : f32 to vector<8x128xf32>
    %108 = arith.mulf %107, %106 : vector<8x128xf32>
    %cst_54 = arith.constant 0.707106769 : f32
    %109 = vector.broadcast %cst_54 : f32 to vector<8x128xf32>
    %110 = arith.mulf %106, %109 : vector<8x128xf32>
    %111 = math.erf %110 : vector<8x128xf32>
    %cst_55 = arith.constant 1.000000e+00 : f32
    %112 = vector.broadcast %cst_55 : f32 to vector<8x128xf32>
    %113 = arith.addf %112, %111 : vector<8x128xf32>
    %114 = arith.mulf %108, %113 : vector<8x128xf32>
    %115 = arith.truncf %114 : vector<8x128xf32> to vector<8x128xbf16>
    %c0_56 = arith.constant 0 : index
    %c0_57 = arith.constant 0 : index
    %c0_58 = arith.constant 0 : index
    %116 = vector.load %arg12[%c0_56, %c0_57, %c0_58] : memref<1x128x32xbf16, #tpu.memory_space<vmem>>, vector<1x128x32xbf16>
    %117 = vector.shape_cast %116 : vector<1x128x32xbf16> to vector<128x32xbf16>
    %cst_59 = arith.constant dense<0.000000e+00> : vector<8x32xf32>
    %118 = tpu.matmul %115, %117, %cst_59 {dimension_numbers = #tpu.dot_dimension_numbers<[1], [0], [0], [1], [0, 0, 1, 1], [], []>} : vector<8x128xbf16>, vector<128x32xbf16>, vector<8x32xf32> -> vector<8x32xf32>
    %c0_60 = arith.constant 0 : index
    %c0_61 = arith.constant 0 : index
    %c0_62 = arith.constant 0 : index
    %119 = vector.load %arg13[%c0_60, %c0_61, %c0_62] : memref<1x1x32xf32, #tpu.memory_space<vmem>>, vector<1x1x32xf32>
    %120 = vector.shape_cast %119 : vector<1x1x32xf32> to vector<1x32xf32>
    %121 = vector.broadcast %120 : vector<1x32xf32> to vector<8x32xf32>
    %122 = arith.addf %118, %121 : vector<8x32xf32>
    %123 = arith.addf %73, %122 : vector<8x32xf32>
    %c0_63 = arith.constant 0 : index
    %c0_64 = arith.constant 0 : index
    %124 = vector.load %arg16[%c0_63, %c0_64] : memref<8x32xf32, #tpu.memory_space<vmem>>, vector<8x32xf32>
    tpu.vector_store %arg16[%c0_63, %c0_64], %123 {strides = array<i32>} : memref<8x32xf32, #tpu.memory_space<vmem>>, vector<8x32xf32>,
    %c1_i32_65 = arith.constant 1 : i32
    %125 = arith.cmpi eq, %arg1, %c1_i32_65 : i32
    %126 = arith.extui %125 : i1 to i32
    %c0_i32_66 = arith.constant 0 : i32
    %127 = arith.cmpi ne, %126, %c0_i32_66 : i32
    scf.if %127 {
      %c0_67 = arith.constant 0 : index
      %c0_68 = arith.constant 0 : index
      %128 = vector.load %arg16[%c0_67, %c0_68] : memref<8x32xf32, #tpu.memory_space<vmem>>, vector<8x32xf32>
      %c0_69 = arith.constant 0 : index
      %c0_70 = arith.constant 0 : index
      %129 = vector.load %arg14[%c0_69, %c0_70] : memref<1x32xf32, #tpu.memory_space<vmem>>, vector<1x32xf32>
      %130 = arith.mulf %128, %128 : vector<8x32xf32>
      %cst_71 = arith.constant dense<0.000000e+00> : vector<8xf32>
      %131 = vector.multi_reduction <add>, %130, %cst_71 [1] : vector<8x32xf32> to vector<8xf32>
      %132 = vector.shape_cast %131 : vector<8xf32> to vector<8x1xf32>
      %133 = math.sqrt %132 : vector<8x1xf32>
      %cst_72 = arith.constant 0.176776692 : f32
      %134 = vector.broadcast %cst_72 : f32 to vector<8x1xf32>
      %135 = arith.mulf %133, %134 : vector<8x1xf32>
      %cst_73 = arith.constant 9.99999993E-9 : f32
      %136 = vector.broadcast %cst_73 : f32 to vector<8x1xf32>
      %137 = arith.maximumf %135, %136 : vector<8x1xf32>
      %138 = tpu.reciprocal %137 {approx = true} : vector<8x1xf32> -> vector<8x1xf32>
      %139 = vector.broadcast %138 : vector<8x1xf32> to vector<8x32xf32>
      %140 = arith.mulf %128, %139 : vector<8x32xf32>
      %141 = vector.broadcast %129 : vector<1x32xf32> to vector<8x32xf32>
      %142 = arith.mulf %140, %141 : vector<8x32xf32>
      %c0_74 = arith.constant 0 : index
      %c0_75 = arith.constant 0 : index
      %c0_76 = arith.constant 0 : index
      %143 = vector.load %arg15[%c0_74, %c0_75, %c0_76] : memref<1x8x32xf32, #tpu.memory_space<vmem>>, vector<1x8x32xf32>
      %144 = vector.shape_cast %143 : vector<1x8x32xf32> to vector<8x32xf32>
      %145 = vector.shape_cast %142 : vector<8x32xf32> to vector<1x8x32xf32>
      tpu.vector_store %arg15[%c0_74, %c0_75, %c0_76], %145 {strides = array<i32>} : memref<1x8x32xf32, #tpu.memory_space<vmem>>, vector<1x8x32xf32>,
    } else {
    }
    return
  }
  func.func @transform_0(%arg0: i32, %arg1: i32) -> (i32, i32, i32) {
    %c0_i32 = arith.constant 0 : i32
    %c0_i32_0 = arith.constant 0 : i32
    %c0_i32_1 = arith.constant 0 : i32
    return %arg0, %c0_i32, %c0_i32_0 : i32, i32, i32
  }
  func.func @transform_1(%arg0: i32, %arg1: i32) -> (i32, i32, i32) {
    %c0_i32 = arith.constant 0 : i32
    %c0_i32_0 = arith.constant 0 : i32
    %c0_i32_1 = arith.constant 0 : i32
    %c0_i32_2 = arith.constant 0 : i32
    return %c0_i32, %c0_i32_0, %c0_i32_1 : i32, i32, i32
  }
  func.func @transform_2(%arg0: i32, %arg1: i32) -> (i32, i32, i32) {
    %c0_i32 = arith.constant 0 : i32
    %c0_i32_0 = arith.constant 0 : i32
    %c0_i32_1 = arith.constant 0 : i32
    return %arg1, %c0_i32, %c0_i32_0 : i32, i32, i32
  }
  func.func @transform_3(%arg0: i32, %arg1: i32) -> (i32, i32, i32, i32) {
    %c0_i32 = arith.constant 0 : i32
    %c0_i32_0 = arith.constant 0 : i32
    %c0_i32_1 = arith.constant 0 : i32
    %c0_i32_2 = arith.constant 0 : i32
    return %arg1, %c0_i32, %c0_i32_0, %c0_i32_1 : i32, i32, i32, i32
  }
  func.func @transform_4(%arg0: i32, %arg1: i32) -> (i32, i32, i32) {
    %c0_i32 = arith.constant 0 : i32
    %c0_i32_0 = arith.constant 0 : i32
    %c0_i32_1 = arith.constant 0 : i32
    return %arg1, %c0_i32, %c0_i32_0 : i32, i32, i32
  }
  func.func @transform_5(%arg0: i32, %arg1: i32) -> (i32, i32, i32) {
    %c0_i32 = arith.constant 0 : i32
    %c0_i32_0 = arith.constant 0 : i32
    %c0_i32_1 = arith.constant 0 : i32
    return %arg1, %c0_i32, %c0_i32_0 : i32, i32, i32
  }
  func.func @transform_6(%arg0: i32, %arg1: i32) -> (i32, i32, i32, i32) {
    %c0_i32 = arith.constant 0 : i32
    %c0_i32_0 = arith.constant 0 : i32
    %c0_i32_1 = arith.constant 0 : i32
    %c0_i32_2 = arith.constant 0 : i32
    return %arg1, %c0_i32, %c0_i32_0, %c0_i32_1 : i32, i32, i32, i32
  }
  func.func @transform_7(%arg0: i32, %arg1: i32) -> (i32, i32, i32) {
    %c0_i32 = arith.constant 0 : i32
    %c0_i32_0 = arith.constant 0 : i32
    %c0_i32_1 = arith.constant 0 : i32
    return %arg1, %c0_i32, %c0_i32_0 : i32, i32, i32
  }
  func.func @transform_8(%arg0: i32, %arg1: i32) -> (i32, i32, i32) {
    %c0_i32 = arith.constant 0 : i32
    %c0_i32_0 = arith.constant 0 : i32
    %c0_i32_1 = arith.constant 0 : i32
    return %arg1, %c0_i32, %c0_i32_0 : i32, i32, i32
  }
  func.func @transform_9(%arg0: i32, %arg1: i32) -> (i32, i32, i32) {
    %c0_i32 = arith.constant 0 : i32
    %c0_i32_0 = arith.constant 0 : i32
    %c0_i32_1 = arith.constant 0 : i32
    return %arg1, %c0_i32, %c0_i32_0 : i32, i32, i32
  }
  func.func @transform_10(%arg0: i32, %arg1: i32) -> (i32, i32, i32) {
    %c0_i32 = arith.constant 0 : i32
    %c0_i32_0 = arith.constant 0 : i32
    %c0_i32_1 = arith.constant 0 : i32
    return %arg1, %c0_i32, %c0_i32_0 : i32, i32, i32
  }
  func.func @transform_11(%arg0: i32, %arg1: i32) -> (i32, i32, i32) {
    %c0_i32 = arith.constant 0 : i32
    %c0_i32_0 = arith.constant 0 : i32
    %c0_i32_1 = arith.constant 0 : i32
    return %arg1, %c0_i32, %c0_i32_0 : i32, i32, i32
  }
  func.func @transform_12(%arg0: i32, %arg1: i32) -> (i32, i32) {
    %c0_i32 = arith.constant 0 : i32
    %c0_i32_0 = arith.constant 0 : i32
    %c0_i32_1 = arith.constant 0 : i32
    return %c0_i32, %c0_i32_0 : i32, i32
  }
  func.func @transform_13(%arg0: i32, %arg1: i32) -> (i32, i32, i32) {
    %c0_i32 = arith.constant 0 : i32
    %c0_i32_0 = arith.constant 0 : i32
    %c0_i32_1 = arith.constant 0 : i32
    return %arg0, %c0_i32, %c0_i32_0 : i32, i32, i32
  }
}

</mosaic_0001>

<bundles_post_ra>
// kernel: tpu_custom_call.1
= control target key start
LH: loop header
LB: loop body
LE: loop exit
PB: predicated region body
PF: predicated region fallthrough
CT: control target
= control target key end

     0   :  { %s2333_s0 = inlined_call_operand.vmem [shape: f32[2,8,32], index: 0, kind: input, shape index: {}]   ;;  %s2334_s1 = inlined_call_operand.vmem [shape: f32[4,8,8], index: 1, kind: input, shape index: {}]   ;;  %s2335_s2 = inlined_call_operand.vmem [shape: f32[2,1,32], index: 2, kind: input, shape index: {}]   ;;  %s2336_s3 = inlined_call_operand.vmem [shape: bf16[2,4,32,16], index: 3, kind: input, shape index: {}]   ;;  %s2337_s4 = inlined_call_operand.vmem [shape: bf16[2,32,16], index: 4, kind: input, shape index: {}]   ;;  %s2338_s5 = inlined_call_operand.vmem [shape: bf16[2,32,16], index: 5, kind: input, shape index: {}]   ;;  %s2339_s6 = inlined_call_operand.vmem [shape: bf16[2,4,16,32], index: 6, kind: input, shape index: {}]   ;;  %s2340_s7 = inlined_call_operand.vmem [shape: f32[2,1,32], index: 7, kind: input, shape index: {}]   ;;  %s2341_s8 = inlined_call_operand.vmem [shape: bf16[2,32,128], index: 8, kind: input, shape index: {}]   ;;  %s2342_s9 = inlined_call_operand.vmem [shape: f32[2,1,128], index: 9, kind: input, shape index: {}]   ;;  %s2343_s10 = inlined_call_operand.vmem [shape: bf16[2,128,32], index: 10, kind: input, shape index: {}]   ;;  %s2344_s11 = inlined_call_operand.vmem [shape: f32[2,1,32], index: 11, kind: input, shape index: {}]   ;;  %s2345_s12 = inlined_call_operand.vmem [shape: f32[1,32], index: 12, kind: input, shape index: {}]   ;;  %s2346_s13 = inlined_call_operand.hbm [shape: f32[2,8,32], index: 13, kind: output, shape index: {}]  }
   0x1   :  { %2362 = sst [smem:[#allocation18_spill]] %s2333_s0 }
   0x2   :  { %2363 = sst [smem:[#allocation19_spill]] %s2334_s1 }
   0x3   :  { %2364 = sst [smem:[#allocation20_spill]] %s2335_s2 }
   0x4   :  { %2365 = sst [smem:[#allocation21_spill]] %s2336_s3 }
   0x5   :  { %2366 = sst [smem:[#allocation22_spill]] %s2337_s4 }
   0x6   :  { %2367 = sst [smem:[#allocation23_spill]] %s2338_s5 }
   0x7   :  { %2368 = sst [smem:[#allocation24_spill]] %s2345_s12 }
   0x8   :  { %2369 = sst [smem:[#allocation25_spill]] %s2346_s13 }
   0x9   :  { %18 = vsyncpa [#allocation4], 0 }
   0xa   :  { %20 = vsyncpa [#allocation4 + $0x1], 0  ;;  %s2028_s25 = smov 0   ;;  %s2030_s26 = smov 0  }
   0xb   :  { %s2032_s27 = smov 0   ;;  %s2034_s28 = smov 0  }
   0xc   :  { %s2036_s29 = smov 0   ;;  %s2038_s30 = smov 0  }
   0xd   :  { %s2040_s14 = smov 0   ;;  %s2042_s15 = smov 0  }
   0xe LB: > { %2370 = sst [smem:[#allocation6_spill]] %s1928_s25  ;;  %s1575_s16 = sadd.s32 4294967295, %s1956_s15   ;;  %s1956_s15 = sphi %s2042_s15, %s26_s15   ;;  %s1952_s14 = sphi %s2040_s14, %s2409_s14   ;;  %s1948_s30 = sphi %s2038_s30, %s2408_s30   ;;  %s1944_s29 = sphi %s2036_s29, %s2407_s29   ;;  %s1940_s28 = sphi %s2034_s28, %s2406_s28   ;;  %s1936_s27 = sphi %s2032_s27, %s2405_s27   ;;  %s1932_s26 = sphi %s2030_s26, %s2404_s26   ;;  %s1928_s25 = sphi %s2028_s25, %s2403_s25  }
   0xf   : > { %2371 = sst [smem:[#allocation7_spill]] %s1932_s26  ;;  %s1576_s17 = sadd.s32 4294967294, %s1956_s15  }
  0x10   : > { %2372 = sst [smem:[#allocation8_spill]] %s1936_s27  ;;  %s35_s18 = sadd.s32 1, %s1948_s30 }
  0x11   : > { %2373 = sst [smem:[#allocation9_spill]] %s1944_s29  ;;  %p36_p0 = scmp.ge.s32.totalorder %s35_s18, 2 }
  0x12   : > { %2374 = sst [smem:[#allocation10_spill]] %s1948_s30  ;;  %s38_s19 = sadd.s32 1, %s1952_s14 }
  0x13   : > { %2375 = sst [smem:[#allocation11_spill]] %s1952_s14  ;;  %p383_p1 = scmp.ne.s32.totalorder %s1936_s27, %s1932_s26 }
  0x14   : > { %2376 = sst [smem:[#allocation12_spill]] %s1956_s15  ;;  %p384_p2 = scmp.eq.s32.totalorder %s1575_s16, 3 }
  0x15   : > { %s2411_s18 = smov (%p36_p0, %s35_s18), 0  ;;  %s2413_s19 = smov (!%p36_p0, %s38_s19), %s1952_s14 }
  0x16   : > { %2377 = sst [smem:[#allocation13_spill]] %s2411_s18  ;;  %p2077_p3 = por %p384_p2, %p383_p1 }
  0x17   : > { %p389_p4 = scmp.ne.s32.totalorder %s1932_s26, %s1928_s25  ;;  %p40_p5 = scmp.ge.s32.totalorder %s2413_s19, 2 }
  0x18   : > { %s2378_s20 = scalar_select %p2077_p3, 1, 0 }
  0x19   : > { %p390_p6 = scmp.eq.s32.totalorder %s1576_s17, 3  ;;  %p1579_p7 = scmp.ge.s32.totalorder %s1956_s15, 1 }
  0x1a   : > { %2379 = sst [smem:[#allocation14_spill]] %s2378_s20  ;;  %p493_p8 = scmp.lt.s32.totalorder %s1956_s15, 5 }
  0x1b   : > { %s2415_s19 = smov (%p40_p5, %s2413_s19), 0  ;;  %p2087_p9 = por %p390_p6, %p389_p4 }
  0x1c   : > { %2380 = sst [smem:[#allocation15_spill]] %s2415_s19  ;;  %p494_p10 = pnand %p1579_p7, %p493_p8 }
  0x1d   : > { %s2381_s21 = scalar_select %p2087_p9, 1, 0 }
  0x1e   : > { %s370_s22 = ssub.s32 %s1952_s14, %s2415_s19  ;;  %s373_s23 = sadd.s32 1, %s1936_s27 }
  0x1f   : > { %2382 = sst [smem:[#allocation16_spill]] %s2381_s21  ;;  %p371_p11 = scmp.eq.s32.totalorder %s370_s22, 0 }
  0x20   : > { %497 = sbr.rel (%p494_p10) target bundleno = 1713 (0x6b1), region = 72  ;;  %s2350_s16 = sand.u32 (!%p494_p10), 1, %s1932_s26  }
  0x21   : > { %s2095_s24 = scalar_select %p371_p11, %s1936_s27, %s373_s23  }
  0x22   : > { %p578_p12 = scmp.lt.s32.totalorder (!%p494_p10), %s1944_s29, 1  ;;  %s2101_s17 = sshll.u32 (!%p494_p10), %s2350_s16, 3 }
  0x23   : > { %2383 = sst [smem:[#allocation17_spill]] %s2095_s24  ;;  %p582_p13 = scmp.lt.s32.totalorder (!%p494_p10), %s1940_s28, 1 }
  0x24   : > { %s2384_s0 = sld [smem:[#allocation18_spill]] (!%p494_p10)  ;;  %s577_s27 = scalar_lea.vmem (!%p494_p10), [#allocation3], %s2101_s17 }
  0x25   : > { %s579_s18 = scalar_select %p578_p12, %s1944_s29, 1 }
  0x26   : > { %s2106_s30 = scalar_select %p582_p13, %s1940_s28, 1 }
  0x27   : > { %s1581_s22 = sshll.u32 %s579_s18, 3  ;;  %s2386_s3 = sld [smem:[#allocation21_spill]] }
  0x28   : > { %s1724_s21 = sshll.u32 %s2106_s30, 6  ;;  %s1725_s25 = sshll.u32 %s2106_s30, 4 }
  0x29   : > { %s2387_s4 = sld [smem:[#allocation22_spill]]  ;;  %s607_s15 = scalar_lea.vmem %s2340_s7, %s2106_s30 }
  0x2a   : > { %s581_s14 = scalar_lea.vmem %s2384_s0, %s1581_s22  ;;  %s2388_s5 = sld [smem:[#allocation23_spill]] }
  0x2b   : > { %s1727_s22 = sshll.u32 %s2106_s30, 5  ;;  %s2145_s26 = scalar_lea.vmem %s2341_s8, %s1725_s25 }
  0x2c   : > { %s2136_s23 = scalar_lea.vmem %s2339_s6, %s1727_s22  ;;  %s615_s1 = scalar_lea.vmem %s2342_s9, %s2106_s30 }
  0x2d   : > { %s2120_s20 = scalar_lea.vmem %s2386_s3, %s1724_s21  ;;  %s2154_s2 = scalar_lea.vmem %s2343_s10, %s1724_s21 }
  0x2e   : > { %s623_s16 = scalar_lea.vmem %s2344_s11, %s2106_s30  ;;  %p1594_p0 = scmp.ne.s32.totalorder %s1940_s28, 0 }
  0x2f   : > { %s2125_s12 = scalar_lea.vmem %s2387_s4, %s1725_s25 }
  0x30   : > { %s2130_s19 = scalar_lea.vmem %s2388_s5, %s1725_s25  ;;  %628 = sbr.rel (%p1594_p0) target bundleno = 55 (0x37), region = 76 }
  0x35   : > { %v629_v0 = vld [vmem:[%s581_s14] sm:$0xff]  ;;  %vm630_vm0 = vcmask 261120  }
  0x36   : > { %631 = vst.msk [vmem:[#allocation2] sm:$0xff] %vm630_vm0, %v629_v0 }
  0x37 PF: > { %v634_v2 = vlaneseq  ;;  %vm644_vm3 = vcmask 261120   ;;  %v1731_v10 = vld [vmem:[%s2120_s20 + $0x8] sm:$0xff]  ;;  %v1733_v11 = vld [vmem:[%s2120_s20 + $0x18] sm:$0xff]  ;;  %v1730_v14 = vld [vmem:[%s2120_s20] sm:$0xff]  ;;  %s2389_s4 = sld [smem:[#allocation20_spill]]  ;;  %vm852_vm6 = vcmask 130048  }
  0x38   : > { %v1735_v12 = vld [vmem:[%s2120_s20 + $0x28] sm:$0xff]  ;;  %v1737_v13 = vld [vmem:[%s2120_s20 + $0x38] sm:$0xff]  ;;  %706 = vmatpush.bf16.msra.mxu0 %v1731_v10  ;;  %731 = vmatpush.bf16.msra.mxu1 %v1733_v11  ;;  %v1732_v15 = vld [vmem:[%s2120_s20 + $0x10] sm:$0xff]  ;;  %vm984_vm7 = vcmask 1043456   ;;  %s2391_s14 = sld [smem:[#allocation19_spill]]  ;;  %vm932_vm8 = vcmask 64512  }
  0x39   : > { %v2165_v4 = vshrl.u32 %v634_v2, 7  ;;  %v2167_v5 = vand.u32 127, %v634_v2  ;;  %756 = vmatpush.bf16.msra.mxu2 %v1735_v12  ;;  %781 = vmatpush.bf16.msra.mxu3 %v1737_v13  ;;  %v1734_v16 = vld [vmem:[%s2120_s20 + $0x20] sm:$0xff]  ;;  %v1736_v17 = vld [vmem:[%s2120_s20 + $0x30] sm:$0xff]  ;;  %v1739_v21 = vld [vmem:[%s2125_s12 + $0x8] sm:$0xff]  ;;  %p1719_p1 = scmp.ne.s32.totalorder %s1940_s28, 1 }
  0x3a   : > { %v1741_v22 = vld [vmem:[%s2130_s19 + $0x8] sm:$0xff]  ;;  %v1738_v24 = vld [vmem:[%s2125_s12] sm:$0xff] }
  0x3b   : > { %vm638_vm1 = vcmp.eq.s32.totalorder %v2165_v4, 0  ;;  %vm640_vm2 = vcmp.ge.s32.totalorder %v2167_v5, 16  ;;  %v1740_v25 = vld [vmem:[%s2130_s19] sm:$0xff] }
  0x3c   : > { %707 = vmatpush.bf16.msra.mxu0 %v1730_v14  ;;  %732 = vmatpush.bf16.msra.mxu1 %v1732_v15 }
  0x3d   : > { %v2162_v1 = vld [vmem:[#allocation2] sm:$0xff]  ;;  %757 = vmatpush.bf16.msra.mxu2 %v1734_v16  ;;  %782 = vmatpush.bf16.msra.mxu3 %v1736_v17  ;;  %s2390_s5 = scalar_lea.vmem %s2389_s4, %s2106_s30 }
  0x3e   : > { %v633_v3 = vrot.slane %v2162_v1, 7  ;;  %v1827_v35 = vld [vmem:[%s2390_s5] ss:$0 sm:$0xff]  ;;  %s2392_s20 = smov %s2391_s14  ;;  %v927_v62 = vld [vmem:[%s2391_s14 + $0x18] sm:$0xff] }
  0x40   : > { %v639_v6 = vsel %vm638_vm1, 0.0, %v633_v3  ;;  %810 = vmatpush.bf16.msrb.mxu0 %v1739_v21  ;;  %839 = vmatpush.bf16.msrb.mxu1 %v1741_v22 }
  0x41   : > { %v641_v7 = vsel %vm640_vm2, %v639_v6, %v2162_v1 }
  0x42   : > { %v643_v8 = vmul.f32 %v641_v7, %v641_v7 }
  0x44   : > { %v645_v9 = vsel %vm644_vm3, %v643_v8, 0.0  ;;  %811 = vmatpush.bf16.msrb.mxu0 %v1738_v24  ;;  %840 = vmatpush.bf16.msrb.mxu1 %v1740_v25  ;;  %v924_v8 = vld [vmem:[%s2392_s20] sm:$0xff] }
  0x45   : > { %646 = vadd.xlane.f32.xlu0 %v645_v9 }
  0xb8   : > { %v647_v18 = vpop.xlane.xlu0 %646 }
  0xb9   : > { %1831 = vrsqrt.f32 %v647_v18  ;;  %vm655_vm4 = vcmp.eq.f32.partialorder %v647_v18, inf  ;;  %v658_v30 = vand.u32 2147483648, %v647_v18  ;;  %vm657_vm5 = vcmp.eq.f32.partialorder %v647_v18, 0.0 }
  0xbf   : > { %v1832_v19 = vpop.eup %1831 }
  0xc0   : > { %v649_v20 = vmul.f32 %v1832_v19, %v647_v18 }
  0xc2   : > { %v650_v23 = vmul.f32 %v1832_v19, %v649_v20 }
  0xc4   : > { %v651_v26 = vmul.f32 0.5, %v650_v23 }
  0xc6   : > { %v652_v27 = vsub.f32 1.5, %v651_v26 }
  0xc8   : > { %v653_v28 = vmul.f32 %v1832_v19, %v652_v27 }
  0xca   : > { %v654_v29 = vmul.f32 %v653_v28, %v647_v18 }
  0xcc   : > { %v656_v31 = vsel %vm655_vm4, %v647_v18, %v654_v29  ;;  %v926_v18 = vld [vmem:[%s2392_s20 + $0x10] sm:$0xff] }
  0xcd   : > { %v659_v32 = vsel %vm657_vm5, %v658_v30, %v656_v31 }
  0xce   : > { %v660_v33 = vmul.f32 0.17677669, %v659_v32 }
  0xd0   : > { %v661_v34 = vmax.f32 %v660_v33, 1e-08 }
  0xd2   : > { %1833 = vrcp.f32 %v661_v34 }
  0xd8   : > { %v1834_v36 = vpop.eup %1833 }
  0xd9   : > { %v663_v37 = vmul.f32 %v1834_v36, %v641_v7  ;;  %v925_v7 = vld [vmem:[%s2392_s20 + $0x8] sm:$0xff] }
  0xdb   : > { %v667_v38 = vmul.f32 %v1827_v35, %v663_v37 }
  0xdd   : > { %v668_v39 = vpack.c.bf16 %v667_v38, %v667_v38 }
  0xdf   : > { %1603 = vmatmul.msk.bf16.vlgmr.msra.gmra.mxu0 %vm644_vm3, %v668_v39  ;;  %1612 = vmatmul.msk.bf16.vlgmr.msra.gmra.mxu1 %vm644_vm3, %v668_v39 }
  0xe0   : > { %1621 = vmatmul.msk.bf16.vlgmr.msra.gmra.mxu2 %vm644_vm3, %v668_v39  ;;  %1630 = vmatmul.msk.bf16.vlgmr.msra.gmra.mxu3 %vm644_vm3, %v668_v39 }
  0xef   : > { %1639 = vmatmul.msk.bf16.vlgmr.msrb.gmra.mxu0 %vm644_vm3, %v668_v39  ;;  %1648 = vmatmul.msk.bf16.vlgmr.msrb.gmra.mxu1 %vm644_vm3, %v668_v39 }
 0x15c   : > { %v709_v40 = vpop.f32.mrf.mxu0  ;;  %v734_v41 = vpop.f32.mrf.mxu1 }
 0x15d   : > { %v848_v56 = vpack.c.bf16 %v709_v40, %v709_v40  ;;  %v849_v57 = vpack.c.bf16 %v734_v41, %v734_v41 }
 0x163   : > { %v759_v42 = vpop.f32.mrf.mxu2  ;;  %v784_v43 = vpop.f32.mrf.mxu3 }
 0x164   : > { %v711_v44 = vpop.f32.mrf.mxu0  ;;  %v736_v45 = vpop.f32.mrf.mxu1  ;;  %v850_v58 = vpack.c.bf16 %v759_v42, %v759_v42  ;;  %v851_v59 = vpack.c.bf16 %v784_v43, %v784_v43  ;;  %v1742_v43 = vld [vmem:[%s2136_s23] sm:$0xff] }
 0x165   : > { %v1743_v44 = vld [vmem:[%s2136_s23 + $0x8] sm:$0xff] }
 0x16b   : > { %v761_v46 = vpop.f32.mrf.mxu2  ;;  %v786_v47 = vpop.f32.mrf.mxu3 }
 0x16c   : > { %v813_v48 = vpop.f32.mrf.mxu0  ;;  %v842_v49 = vpop.f32.mrf.mxu1 }
 0x16d   : > { %v846_v50 = vpack.c.bf16 %v813_v48, %v813_v48  ;;  %v847_v51 = vpack.c.bf16 %v842_v49, %v842_v49 }
 0x16f   : > { %v857_v52 = vsel %vm852_vm6, %v846_v50, 0  ;;  %v986_v53 = vsel %vm984_vm7, %v847_v51, 0 }
 0x170   : > { %866 = vmatpush.bf16.xpose.msrb.mxu2 %v857_v52  ;;  %882 = vmatpush.bf16.xpose.msrb.mxu3 %v857_v52 }
 0x171   : > { %898 = vmatpush.bf16.xpose.msra.mxu0 %v857_v52  ;;  %914 = vmatpush.bf16.xpose.msra.mxu1 %v857_v52 }
 0x174   : > { %v815_v54 = vpop.f32.mrf.mxu0  ;;  %v844_v55 = vpop.f32.mrf.mxu1 }
 0x177   : > { %1649 = vmatmul.msk.bf16.vlgmr.msrb.gmra.mxu2 %vm852_vm6, %v848_v56  ;;  %1650 = vmatmul.msk.bf16.vlgmr.msrb.gmra.mxu3 %vm852_vm6, %v849_v57 }
 0x178   : > { %995 = vmatpush.bf16.msra.mxu2 %v986_v53  ;;  %1011 = vmatpush.bf16.msra.mxu3 %v986_v53 }
 0x179   : > { %1027 = vmatpush.bf16.msrb.mxu0 %v986_v53  ;;  %1043 = vmatpush.bf16.msrb.mxu1 %v986_v53 }
 0x17a   : > { %1651 = vmatmul.msk.bf16.vlgmr.msra.gmra.mxu0 %vm852_vm6, %v850_v58  ;;  %1652 = vmatmul.msk.bf16.vlgmr.msra.gmra.mxu1 %vm852_vm6, %v851_v59 }
 0x17c   : > { %1077 = vmatpush.bf16.msrb.mxu2 %v1742_v43  ;;  %1099 = vmatpush.bf16.msrb.mxu3 %v1743_v44 }
 0x1f7   : > { %v900_v60 = vpop.f32.mrf.mxu0  ;;  %v916_v61 = vpop.f32.mrf.mxu1 }
 0x1f8   : > { %v923_v63 = vmul.f32 0.25, %v916_v61  ;;  %v922_v15 = vmul.f32 0.25, %v900_v60  ;;  %v1744_v61 = vld [vmem:[%s2136_s23 + $0x10] sm:$0xff] }
 0x1f9   : > { %1121 = vmatpush.bf16.msra.mxu0 %v1744_v61 }
 0x1fa   : > { %v931_v0 = vadd.f32 %v927_v62, %v923_v63  ;;  %v868_v3 = vpop.f32.mrf.mxu2  ;;  %v884_v6 = vpop.f32.mrf.mxu3  ;;  %v930_v21 = vadd.f32 %v926_v18, %v922_v15  ;;  %v1745_v62 = vld [vmem:[%s2136_s23 + $0x18] sm:$0xff] }
 0x1fb   : > { %v920_v9 = vmul.f32 0.25, %v868_v3  ;;  %v921_v10 = vmul.f32 0.25, %v884_v6  ;;  %1143 = vmatpush.bf16.msra.mxu1 %v1745_v62 }
 0x1fc   : > { %v942_v2 = vsel %vm932_vm8, %v931_v0, -inf  ;;  %v939_v22 = vsel %vm932_vm8, %v930_v21, -inf }
 0x1fd   : > { %943 = vmax.xlane.f32.xlu2 %v942_v2  ;;  %v929_v13 = vadd.f32 %v925_v7, %v921_v10  ;;  %v928_v14 = vadd.f32 %v924_v8, %v920_v9 }
 0x1ff   : > { %v902_v11 = vpop.f32.mrf.mxu0  ;;  %v918_v12 = vpop.f32.mrf.mxu1  ;;  %v936_v16 = vsel %vm932_vm8, %v929_v13, -inf  ;;  %v933_v17 = vsel %vm932_vm8, %v928_v14, -inf }
 0x200   : > { %937 = vmax.xlane.f32.xlu1 %v936_v16  ;;  %934 = vmax.xlane.f32.xlu0 %v933_v17 }
 0x202   : > { %v870_v19 = vpop.f32.mrf.mxu2  ;;  %v886_v20 = vpop.f32.mrf.mxu3 }
 0x208   : > { %940 = vmax.xlane.f32.xlu1 %v939_v22 }
 0x270   : > { %v944_v25 = vpop.xlane.xlu2 %943 }
 0x271   : > { %v948_v30 = vsub.f32 %v931_v0, %v944_v25 }
 0x273   : > { %v938_v23 = vpop.xlane.xlu1 %937  ;;  %v935_v24 = vpop.xlane.xlu0 %934  ;;  %v955_v31 = vmul.f32 1.442695, %v948_v30 }
 0x274   : > { %v946_v26 = vsub.f32 %v929_v13, %v938_v23  ;;  %v945_v27 = vsub.f32 %v928_v14, %v935_v24 }
 0x276   : > { %v951_v28 = vmul.f32 1.442695, %v946_v26  ;;  %v949_v29 = vmul.f32 1.442695, %v945_v27 }
 0x278   : > { %1835 = vpow2.f32 %v951_v28 }
 0x279   : > { %1837 = vpow2.f32 %v949_v29 }
 0x27a   : > { %1839 = vpow2.f32 %v955_v31 }
 0x27b   : > { %v941_v32 = vpop.xlane.xlu1 %940 }
 0x27c   : > { %v947_v33 = vsub.f32 %v930_v21, %v941_v32 }
 0x27e   : > { %v1836_v34 = vpop.eup %1835  ;;  %v953_v35 = vmul.f32 1.442695, %v947_v33 }
 0x27f   : > { %v1838_v36 = vpop.eup %1837  ;;  %v960_v37 = vsel %vm932_vm8, %v1836_v34, 0.0 }
 0x280   : > { %1841 = vpow2.f32 %v953_v35  ;;  %961 = vadd.xlane.f32.xlu0 %v960_v37  ;;  %v957_v38 = vsel %vm932_vm8, %v1838_v36, 0.0  ;;  %v1840_v39 = vpop.eup %1839  ;;  %v1747_v35 = vld [vmem:[%s2145_s26 + $0x8] sm:$0xff] }
 0x281   : > { %958 = vadd.xlane.f32.xlu2 %v957_v38  ;;  %v966_v42 = vsel %vm932_vm8, %v1840_v39, 0.0 }
 0x286   : > { %v1842_v40 = vpop.eup %1841 }
 0x287   : > { %v963_v41 = vsel %vm932_vm8, %v1842_v40, 0.0 }
 0x288   : > { %964 = vadd.xlane.f32.xlu1 %v963_v41 }
 0x289   : > { %967 = vadd.xlane.f32.xlu2 %v966_v42 }
 0x2f3   : > { %v962_v45 = vpop.xlane.xlu0 %961 }
 0x2f4   : > { %v959_v46 = vpop.xlane.xlu2 %958  ;;  %1843 = vrcp.f32 %v962_v45 }
 0x2f5   : > { %1845 = vrcp.f32 %v959_v46 }
 0x2fa   : > { %v1844_v47 = vpop.eup %1843 }
 0x2fb   : > { %v1846_v48 = vpop.eup %1845  ;;  %v974_v49 = vmul.f32 %v1844_v47, %v1836_v34  ;;  %v965_v50 = vpop.xlane.xlu1 %964  ;;  %v1828_v47 = vld [vmem:[%s607_s15] ss:$0 sm:$0xff] }
 0x2fc   : > { %v973_v51 = vmul.f32 %v1846_v48, %v1838_v36  ;;  %v968_v52 = vpop.xlane.xlu2 %967  ;;  %1847 = vrcp.f32 %v965_v50  ;;  %v1746_v36 = vld [vmem:[%s2145_s26] sm:$0xff] }
 0x2fd   : > { %v978_v53 = vpack.c.bf16 %v974_v49, %v974_v49  ;;  %1849 = vrcp.f32 %v968_v52  ;;  %v1755_v52 = vld [vmem:[%s2154_s2 + $0x38] sm:$0xff] }
 0x2fe   : > { %v977_v54 = vpack.c.bf16 %v973_v51, %v973_v51 }
 0x2ff   : > { %1654 = vmatmul.msk.bf16.vlgmr.msra.gmra.mxu3 %vm932_vm8, %v978_v53  ;;  %v1754_v53 = vld [vmem:[%s2154_s2 + $0x30] sm:$0xff] }
 0x300   : > { %1653 = vmatmul.msk.bf16.vlgmr.msra.gmra.mxu2 %vm932_vm8, %v977_v54  ;;  %1335 = vmatpush.bf16.msra.mxu3 %v1755_v52  ;;  %v1829_v54 = vld [vmem:[%s615_s1] ss:$0 sm:$0xff]  ;;  %s2393_s1 = sld [smem:[#allocation24_spill]] (!%p1719_p1) }
 0x301   : > { %1215 = vmatpush.bf16.msra.mxu2 %v1747_v35 }
 0x302   : > { %v1848_v55 = vpop.eup %1847 }
 0x303   : > { %v1850_v56 = vpop.eup %1849  ;;  %v975_v57 = vmul.f32 %v1848_v55, %v1842_v40 }
 0x304   : > { %v976_v58 = vmul.f32 %v1850_v56, %v1840_v39  ;;  %1336 = vmatpush.bf16.msra.mxu3 %v1754_v53  ;;  %v1753_v56 = vld [vmem:[%s2154_s2 + $0x28] sm:$0xff] }
 0x305   : > { %v979_v59 = vpack.c.bf16 %v975_v57, %v975_v57  ;;  %1216 = vmatpush.bf16.msra.mxu2 %v1746_v36 }
 0x306   : > { %v980_v60 = vpack.c.bf16 %v976_v58, %v976_v58 }
 0x307   : > { %1655 = vmatmul.msk.bf16.vlgmr.msrb.gmra.mxu0 %vm932_vm8, %v979_v59  ;;  %v1752_v59 = vld [vmem:[%s2154_s2 + $0x20] sm:$0xff] }
 0x308   : > { %1656 = vmatmul.msk.bf16.vlgmr.msrb.gmra.mxu1 %vm932_vm8, %v980_v60  ;;  %1337 = vmatpush.bf16.msra.mxu3 %v1753_v56 }
 0x30c   : > { %1338 = vmatpush.bf16.msra.mxu3 %v1752_v59 }
 0x382   : > { %v1013_v63 = vpop.f32.mrf.mxu3 }
 0x383   : > { %v997_v0 = vpop.f32.mrf.mxu2  ;;  %v1050_v2 = vpack.c.bf16 %v1013_v63, %v1013_v63  ;;  %v1751_v63 = vld [vmem:[%s2154_s2 + $0x18] sm:$0xff] }
 0x384   : > { %v1049_v3 = vpack.c.bf16 %v997_v0, %v997_v0  ;;  %v1029_v6 = vpop.f32.mrf.mxu0  ;;  %1339 = vmatpush.bf16.msra.mxu3 %v1751_v63 }
 0x385   : > { %v1051_v7 = vpack.c.bf16 %v1029_v6, %v1029_v6  ;;  %v1045_v8 = vpop.f32.mrf.mxu1  ;;  %1666 = vmatmul.msk.bf16.vlgmr.msrb.gmra.mxu3 %vm852_vm6, %v1050_v2 }
 0x386   : > { %v1052_v9 = vpack.c.bf16 %v1045_v8, %v1045_v8  ;;  %1661 = vmatmul.msk.bf16.vlgmr.msrb.gmra.mxu2 %vm852_vm6, %v1049_v3 }
 0x387   : > { %1671 = vmatmul.msk.bf16.vlgmr.msra.gmra.mxu0 %vm852_vm6, %v1051_v7  ;;  %v1750_v7 = vld [vmem:[%s2154_s2 + $0x10] sm:$0xff] }
 0x388   : > { %1676 = vmatmul.msk.bf16.vlgmr.msra.gmra.mxu1 %vm852_vm6, %v1052_v9  ;;  %1340 = vmatpush.bf16.msra.mxu3 %v1750_v7 }
 0x38a   : > { %v1015_v10 = vpop.f32.mrf.mxu3 }
 0x38b   : > { %v999_v11 = vpop.f32.mrf.mxu2 }
 0x38c   : > { %v1031_v12 = vpop.f32.mrf.mxu0 }
 0x38d   : > { %v1047_v13 = vpop.f32.mrf.mxu1  ;;  %v1749_v12 = vld [vmem:[%s2154_s2 + $0x8] sm:$0xff] }
 0x38e   : > { %1341 = vmatpush.bf16.msra.mxu3 %v1749_v12 }
 0x404   : > { %v1123_v14 = vpop.f32.mrf.mxu0 }
 0x405   : > { %v1145_v15 = vpop.f32.mrf.mxu1  ;;  %v1152_v21 = vsel %vm644_vm3, %v1123_v14, 0.0 }
 0x406   : > { %v1154_v25 = vsel %vm644_vm3, %v1145_v15, 0.0 }
 0x408   : > { %v1101_v16 = vpop.f32.mrf.mxu3 }
 0x409   : > { %v1079_v17 = vpop.f32.mrf.mxu2  ;;  %v1150_v18 = vsel %vm644_vm3, %v1101_v16, 0.0  ;;  %v1748_v16 = vld [vmem:[%s2154_s2] sm:$0xff] }
 0x40a   : > { %v1149_v19 = vsel %vm644_vm3, %v1079_v17, 0.0  ;;  %1342 = vmatpush.bf16.msra.mxu3 %v1748_v16 }
 0x40b   : > { %v1151_v20 = vadd.f32 %v1150_v18, %v1149_v19 }
 0x40c   : > { %v1125_v22 = vpop.f32.mrf.mxu0 }
 0x40d   : > { %v1153_v23 = vadd.f32 %v1152_v21, %v1151_v20  ;;  %v1147_v24 = vpop.f32.mrf.mxu1 }
 0x40f   : > { %v1155_v26 = vadd.f32 %v1154_v25, %v1153_v23 }
 0x410   : > { %v1103_v27 = vpop.f32.mrf.mxu3 }
 0x411   : > { %v2242_v28 = vadd.f32 %v1155_v26, %v2162_v1  ;;  %v1081_v29 = vpop.f32.mrf.mxu2 }
 0x413   : > { %v1157_v30 = vrot.slane %v2242_v28, 7 }
 0x415   : > { %v1158_v31 = vsel %vm638_vm1, 0.0, %v1157_v30 }
 0x416   : > { %v1159_v32 = vsel %vm640_vm2, %v1158_v31, %v2242_v28 }
 0x417   : > { %v1161_v33 = vmul.f32 %v1159_v32, %v1159_v32 }
 0x419   : > { %v1162_v34 = vsel %vm644_vm3, %v1161_v33, 0.0 }
 0x41a   : > { %1163 = vadd.xlane.f32.xlu0 %v1162_v34 }
 0x48d   : > { %v1164_v37 = vpop.xlane.xlu0 %1163 }
 0x48e   : > { %1851 = vrsqrt.f32 %v1164_v37  ;;  %vm1172_vm9 = vcmp.eq.f32.partialorder %v1164_v37, inf  ;;  %v1175_v42 = vand.u32 2147483648, %v1164_v37  ;;  %vm1174_vm10 = vcmp.eq.f32.partialorder %v1164_v37, 0.0 }
 0x494   : > { %v1852_v1 = vpop.eup %1851 }
 0x495   : > { %v1166_v38 = vmul.f32 %v1852_v1, %v1164_v37 }
 0x497   : > { %v1167_v39 = vmul.f32 %v1852_v1, %v1166_v38 }
 0x499   : > { %v1168_v4 = vmul.f32 0.5, %v1167_v39 }
 0x49b   : > { %v1169_v40 = vsub.f32 1.5, %v1168_v4 }
 0x49d   : > { %v1170_v41 = vmul.f32 %v1852_v1, %v1169_v40 }
 0x49f   : > { %v1171_v5 = vmul.f32 %v1170_v41, %v1164_v37 }
 0x4a1   : > { %v1173_v43 = vsel %vm1172_vm9, %v1164_v37, %v1171_v5  ;;  %v1830_v5 = vld [vmem:[%s623_s16] ss:$0 sm:$0xff] }
 0x4a2   : > { %v1176_v44 = vsel %vm1174_vm10, %v1175_v42, %v1173_v43 }
 0x4a3   : > { %v1177_v45 = vmul.f32 0.17677669, %v1176_v44 }
 0x4a5   : > { %v1178_v46 = vmax.f32 %v1177_v45, 1e-08 }
 0x4a7   : > { %1853 = vrcp.f32 %v1178_v46 }
 0x4ad   : > { %v1854_v48 = vpop.eup %1853 }
 0x4ae   : > { %v1180_v49 = vmul.f32 %v1854_v48, %v1159_v32 }
 0x4b0   : > { %v1184_v50 = vmul.f32 %v1828_v47, %v1180_v49 }
 0x4b2   : > { %v1185_v51 = vpack.c.bf16 %v1184_v50, %v1184_v50 }
 0x4b4   : > { %1685 = vmatmul.msk.bf16.vlgmr.msra.gmra.mxu2 %vm644_vm3, %v1185_v51 }
 0x537   : > { %v1218_v55 = vpop.f32.mrf.mxu2 }
 0x538   : > { %v1219_v57 = vadd.f32 %v1829_v54, %v1218_v55 }
 0x53a   : > { %v1223_v58 = vmul.f32 0.70710677, %v1219_v57  ;;  %v1222_v39 = vmul.f32 0.5, %v1219_v57 }
 0x53c   : > { %v1224_v60 = vmul.f32 %v1223_v58, %v1223_v58 }
 0x53e   : > { %v1225_v61 = vmin.f32 %v1224_v60, 16.0 }
 0x53f   : > { %v1220_v62 = vpop.f32.mrf.mxu2 }
 0x540   : > { %v1226_v0 = vmul.f32 2.1237322e-06, %v1225_v61  ;;  %v1237_v2 = vmul.f32 3.8918573e-05, %v1225_v61 }
 0x542   : > { %v1227_v3 = vadd.f32 0.00028619796, %v1226_v0  ;;  %v1238_v6 = vadd.f32 0.001143296, %v1237_v2 }
 0x544   : > { %v1228_v8 = vmul.f32 %v1227_v3, %v1225_v61  ;;  %v1239_v9 = vmul.f32 %v1238_v6, %v1225_v61 }
 0x546   : > { %v1240_v10 = vadd.f32 0.014752088, %v1239_v9  ;;  %v1229_v11 = vadd.f32 0.0036580483, %v1228_v8 }
 0x548   : > { %v1241_v13 = vmul.f32 %v1240_v10, %v1225_v61  ;;  %v1230_v15 = vmul.f32 %v1229_v11, %v1225_v61 }
 0x54a   : > { %v1242_v14 = vadd.f32 0.112945676, %v1241_v13  ;;  %v1231_v19 = vadd.f32 0.05243302, %v1230_v15 }
 0x54c   : > { %v1243_v17 = vmul.f32 %v1242_v14, %v1225_v61  ;;  %v1232_v22 = vmul.f32 %v1231_v19, %v1225_v61 }
 0x54e   : > { %v1244_v18 = vadd.f32 0.4994258, %v1243_v17  ;;  %v1233_v23 = vadd.f32 0.18741608, %v1232_v22 }
 0x550   : > { %v1245_v20 = vmul.f32 %v1244_v18, %v1225_v61  ;;  %v1234_v25 = vmul.f32 %v1233_v23, %v1225_v61 }
 0x552   : > { %v1246_v21 = vadd.f32 1.0, %v1245_v20  ;;  %v1235_v30 = vadd.f32 1.1283791, %v1234_v25 }
 0x554   : > { %1855 = vrcp.f32 %v1246_v21  ;;  %v1258_v29 = vand.u32 2147483648, %v1246_v21  ;;  %v1256_v32 = vand.u32 2147483647, %v1246_v21  ;;  %vm1252_vm12 = vweird.f32 %v1246_v21 }
 0x555   : > { %v1236_v35 = vmul.f32 %v1235_v30, %v1223_v58 }
 0x556   : > { %v1259_v34 = vor.u32 1.1754944e-38, %v1258_v29  ;;  %vm1257_vm14 = vcmp.eq.f32.partialorder %v1256_v32, 8.507059e+37 }
 0x55a   : > { %v1856_v24 = vpop.eup %1855 }
 0x55b   : > { %v1248_v26 = vmul.f32 %v1856_v24, %v1246_v21  ;;  %vm1253_vm11 = vweird.f32 %v1856_v24 }
 0x55c   : > { %vm1254_vm13 = vmor %vm1252_vm12, %vm1253_vm11 }
 0x55d   : > { %v1249_v27 = vsub.f32 1.0, %v1248_v26 }
 0x55f   : > { %v1250_v31 = vmul.f32 %v1856_v24, %v1249_v27 }
 0x561   : > { %v1251_v33 = vadd.f32 %v1856_v24, %v1250_v31 }
 0x563   : > { %v1255_v36 = vsel %vm1254_vm13, %v1856_v24, %v1251_v33 }
 0x564   : > { %v1260_v37 = vsel %vm1257_vm14, %v1259_v34, %v1255_v36 }
 0x565   : > { %v1261_v1 = vmul.f32 %v1260_v37, %v1236_v35 }
 0x567   : > { %v1686_v38 = vclamps-f32 %v1261_v1, 1.0 }
 0x569   : > { %v1264_v4 = vadd.f32 1.0, %v1686_v38 }
 0x56b   : > { %v1265_v40 = vmul.f32 %v1264_v4, %v1222_v39 }
 0x56d   : > { %v1266_v41 = vpack.c.bf16 %v1265_v40, %v1265_v40 }
 0x56f   : > { %1343 = vmatmul.bf16.vlgmr.msra.gmra.mxu3 %v1266_v41 }
 0x5f2   : > { %v1344_v42 = vpop.f32.mrf.mxu3 }
 0x5f3   : > { %v1345_v43 = vadd.f32 %v1830_v5, %v1344_v42 }
 0x5f5   : > { %v1348_v44 = vadd.f32 %v1345_v43, %v2242_v28 }
 0x5f6   : > { %1353 = sbr.rel (%p1719_p1) target bundleno = 1691 (0x69b), region = 80 }
 0x5f7   : > { %1349 = vst.msk [vmem:[#allocation2] sm:$0xff] %vm644_vm3, %v1348_v44 }
 0x5fa   : > { %v1346_v45 = vpop.f32.mrf.mxu3 }
 0x5fb   : > { %v1857_v61 = vld [vmem:[%s2393_s1] ss:$0 sm:$0xff] }
 0x5fe   : > { %v1354_v46 = vld [vmem:[#allocation2] sm:$0xff] }
 0x5ff   : > { %v1356_v47 = vmul.f32 %v1354_v46, %v1354_v46 }
 0x601   : > { %v1357_v48 = vsel %vm644_vm3, %v1356_v47, 0.0 }
 0x602   : > { %1358 = vadd.xlane.f32.xlu0 %v1357_v48 }
 0x675   : > { %v1359_v49 = vpop.xlane.xlu0 %1358 }
 0x676   : > { %1858 = vrsqrt.f32 %v1359_v49  ;;  %vm1367_vm15 = vcmp.eq.f32.partialorder %v1359_v49, inf  ;;  %v1370_v56 = vand.u32 2147483648, %v1359_v49  ;;  %vm1369_vm0 = vcmp.eq.f32.partialorder %v1359_v49, 0.0 }
 0x67c   : > { %v1859_v50 = vpop.eup %1858 }
 0x67d   : > { %v1361_v51 = vmul.f32 %v1859_v50, %v1359_v49 }
 0x67f   : > { %v1362_v52 = vmul.f32 %v1859_v50, %v1361_v51 }
 0x681   : > { %v1363_v53 = vmul.f32 0.5, %v1362_v52 }
 0x683   : > { %v1364_v54 = vsub.f32 1.5, %v1363_v53 }
 0x685   : > { %v1365_v28 = vmul.f32 %v1859_v50, %v1364_v54 }
 0x687   : > { %v1366_v55 = vmul.f32 %v1365_v28, %v1359_v49 }
 0x689   : > { %v1368_v57 = vsel %vm1367_vm15, %v1359_v49, %v1366_v55 }
 0x68a   : > { %v1371_v58 = vsel %vm1369_vm0, %v1370_v56, %v1368_v57 }
 0x68b   : > { %v1372_v59 = vmul.f32 0.17677669, %v1371_v58 }
 0x68d   : > { %v1373_v60 = vmax.f32 %v1372_v59, 1e-08 }
 0x68f   : > { %1860 = vrcp.f32 %v1373_v60 }
 0x695   : > { %v1861_v62 = vpop.eup %1860 }
 0x696   : > { %v1375_v63 = vmul.f32 %v1861_v62, %v1354_v46 }
 0x698   : > { %v1379_v0 = vmul.f32 %v1857_v61, %v1375_v63 }
 0x69a   : > { %1380 = vst.msk [vmem:[%s577_s27] sm:$0xff] %vm644_vm3, %v1379_v0 }
 0x69b PF: > { %s2394_s16 = sld [smem:[#allocation9_spill]]  ;;  %s1394_s13 = sshll.u32 %s577_s27, 4  ;;  %s1395_s13 = int_to_ptr.vmem [resolvable:$true] %s1394_s13 }
 0x69c   : > { %s2395_s3 = sld [smem:[#allocation7_spill]] }
 0x69d   : > { %s2397_s14 = sld [smem:[#allocation25_spill]] }
 0x6a1   : > { %s1721_s5 = sshll.u32 %s2394_s16, 3 }
 0x6a2   : > { %s2399_s18 = sand.u32 1, %s2395_s3  }
 0x6a3   : > { %s2398_s21 = smov %s2397_s14  ;;  %s1392_s19 = scalar_lea.hbm %s2397_s14, %s1721_s5 }
 0x6a4   : > { %s1396_s29 = sshll.u32 %s1392_s19, 4  ;;  %s1382_s22 = scalar_lea.sflag [#allocation4], %s2399_s18  ;;  %s1397_s29 = int_to_ptr.hbm [resolvable:$true] %s1396_s29 }
 0x6a5   : > { %s1876_s23 = sshra.s32 %s1397_s29, 4  ;;  %s1882_s2 = scalar_lea.hbm %s2398_s21, 16  ;;  %s1877_s23 = int_to_ptr.hbm [resolvable:$true] %s1876_s23 }
 0x6a6   : > { %s1878_s26 = scalar_lea.hbm %s1877_s23, 8  ;;  %p1883_p6 = scmp.lt.s32.totalorder %s1877_s23, %s2398_s21 }
 0x6a7   : > { %p1879_p2 = scmp.ne.s32.totalorder %s1877_s23, %s1878_s26  ;;  %p1884_p7 = scmp.lt.s32.totalorder %s1882_s2, %s1878_s26 }
 0x6a9   : > { %p1880_p4 = pnand %p1879_p2, %p2077_p3  ;;  %p1885_p8 = por %p1884_p7, %p1883_p6 }
 0x6ab   : > { %p1881_p5 = pneg %p1880_p4 }
 0x6ad   : > { %p1886_p10 = pnand %p1885_p8, %p1881_p5 }
 0x6af   : > { %1889 = shalt.err (!%p1886_p10)
}
 0x6b0   : > { %1756 = dma.vmem_to_hbm [thread:$0]  (%p2077_p3), %s1395_s13, 128, %s1397_s29, %s1382_s22  }
 0x6b1 PF: > { %s2400_s17 = sld [smem:[#allocation12_spill]] }
 0x6b2   : > { %s2401_s27 = sld [smem:[#allocation6_spill]] }
 0x6b7   : > { %p1762_p11 = scmp.ge.s32.totalorder %s2400_s17, 2 }
 0x6b8   : > { %s1408_s1 = sand.u32 1, %s2401_s27  }
 0x6b9   : > { %p1759_p12 = pnand %p1762_p11, %p2087_p9  ;;  %s1409_s16 = scalar_lea.sflag [#allocation4], %s1408_s1 }
 0x6bb   : > { %p1760_p13 = pneg %p1759_p12 }
 0x6bd   : > { %1923 = dma.done.wait (%p1760_p13), %s1409_s16, 128  }
 0x6be   : > { %1925 = vsyncadd (%p1760_p13), %s1409_s16, 4294967168  ;;  %s26_s15 = sadd.s32 1, %s2400_s17   ;;  %s2403_s25 = sld [smem:[#allocation7_spill]] }
 0x6bf   : > { %p23_p0 = scmp.ge.s32.totalorder %s26_s15, 6   ;;  %s2404_s26 = sld [smem:[#allocation8_spill]] }
 0x6c0   : > { %s2405_s27 = sld [smem:[#allocation17_spill]] }
 0x6c1   : > { %s2406_s28 = sld [smem:[#allocation10_spill]]  ;;  %25 = sbr.rel (!%p23_p0) target bundleno = 14 (0xe), region = 145 }
 0x6c2   : > { %s2407_s29 = sld [smem:[#allocation11_spill]] }
 0x6c3   : > { %s2408_s30 = sld [smem:[#allocation13_spill]] }
 0x6c4   : > { %s2409_s14 = sld [smem:[#allocation15_spill]] }
 0x6c6   :  { %1415 = vsyncpa [#allocation4], 1 }
 0x6c7   :  { %1417 = vsyncpa [#allocation4 + $0x1], 1 }

</bundles_post_ra>
